<compile_context>
chip_gen: v6e
topology: v6e:2x2x1
jax: 0.10.0
libtpu: 0.0.40
codegen_flags: <defaults>
</compile_context>

<pallas_src>
import functools

import jax
import jax.numpy as jnp
from jax.experimental import pallas as pl
from jax.experimental.pallas import tpu as pltpu


def _round_up(x, m):
    return ((x + m - 1) // m) * m


def mlp_kernel(x_ref, w1_ref, b1_ref, w2_ref, b2_ref, o_ref):
    # fc1: (TB, I) @ (I, H) -> f32 accumulation on the MXU.
    h = jnp.dot(x_ref[...], w1_ref[...], preferred_element_type=jnp.float32)
    h = jnp.maximum(h + b1_ref[...], 0.0)  # bias + ReLU on the VPU
    # fc2: (TB, H) @ (H, O)
    z = jnp.dot(h, w2_ref[...], preferred_element_type=jnp.float32)
    z = z + b2_ref[...]
    # Sigmoid: exp on EUP; exact reciprocal keeps 1e-5 accuracy vs reference.
    o_ref[...] = pl.reciprocal(1.0 + jnp.exp(-z), approx=False).astype(o_ref.dtype)


@functools.partial(jax.jit, static_argnames=("block_batch",))
def mlp_forward(x, w1, b1, w2, b2, *, block_batch=256):
    """Fused MLP forward.  x:(B,I), w1:(I,H), b1:(1,H), w2:(H,O), b2:(1,O)."""
    B, I = x.shape
    H = w1.shape[1]
    O = w2.shape[1]

    # Pad feature dims to lane multiples (128) and batch to a sublane-aligned
    # tile.  TB is a multiple of 8 (f32 sublane) and caps at block_batch.
    I_p = _round_up(I, 128)
    H_p = _round_up(H, 128)
    O_p = _round_up(O, 128)
    TB = min(block_batch, _round_up(B, 8))
    B_p = _round_up(B, TB)

    xp = jnp.zeros((B_p, I_p), x.dtype).at[:B, :I].set(x)
    w1p = jnp.zeros((I_p, H_p), w1.dtype).at[:I, :H].set(w1)
    b1p = jnp.zeros((1, H_p), b1.dtype).at[:, :H].set(b1)
    w2p = jnp.zeros((H_p, O_p), w2.dtype).at[:H, :O].set(w2)
    b2p = jnp.zeros((1, O_p), b2.dtype).at[:, :O].set(b2)

    out_p = pl.pallas_call(
        mlp_kernel,
        out_shape=jax.ShapeDtypeStruct((B_p, O_p), x.dtype),
        grid=(B_p // TB,),
        in_specs=[
            pl.BlockSpec((TB, I_p), lambda i: (i, 0)),    # batch-tiled activations
            pl.BlockSpec((I_p, H_p), lambda i: (0, 0)),   # W1 resident in VMEM
            pl.BlockSpec((1, H_p), lambda i: (0, 0)),     # b1 resident
            pl.BlockSpec((H_p, O_p), lambda i: (0, 0)),   # W2 resident
            pl.BlockSpec((1, O_p), lambda i: (0, 0)),     # b2 resident
        ],
        out_specs=pl.BlockSpec((TB, O_p), lambda i: (i, 0)),
        compiler_params=pltpu.CompilerParams(
            dimension_semantics=("parallel",),            # batch tiles independent
            vmem_limit_bytes=64 * 1024 * 1024,
        ),
    )(xp, w1p, b1p, w2p, b2p)

    return out_p[:B, :O]


def init_params(key, input_size, hidden_size, output_size):
    # nn.Linear-style uniform(-1/sqrt(fan_in), +1/sqrt(fan_in)) init,
    # stored as (in, out) = transpose of PyTorch's (out, in).
    k1, k2, k3, k4 = jax.random.split(key, 4)
    bound1 = 1.0 / jnp.sqrt(input_size)
    bound2 = 1.0 / jnp.sqrt(hidden_size)
    w1 = jax.random.uniform(k1, (input_size, hidden_size), jnp.float32, -bound1, bound1)
    b1 = jax.random.uniform(k2, (1, hidden_size), jnp.float32, -bound1, bound1)
    w2 = jax.random.uniform(k3, (hidden_size, output_size), jnp.float32, -bound2, bound2)
    b2 = jax.random.uniform(k4, (1, output_size), jnp.float32, -bound2, bound2)
    return w1, b1, w2, b2


def reference_forward(x, w1, b1, w2, b2):
    h = jnp.maximum(x @ w1 + b1, 0.0)
    return jax.nn.sigmoid(h @ w2 + b2)


# TODO(synk): MLP.fit (BCELoss + Adam training loop) and MLP.predict thresholding
# are training/inference utilities outside the forward pass and are not kernelized.

if __name__ == "__main__":
    key = jax.random.PRNGKey(0)

    # Primary check: small shapes from the module spec.
    batch, input_size, hidden_size, output_size = 8, 32, 64, 8
    kx, kp, key = jax.random.split(key, 3)
    x = jax.random.normal(kx, (batch, input_size), jnp.float32)
    w1, b1, w2, b2 = init_params(kp, input_size, hidden_size, output_size)

    out = jax.block_until_ready(mlp_forward(x, w1, b1, w2, b2))
    ref = reference_forward(x, w1, b1, w2, b2)
    assert out.shape == (batch, output_size)
    assert jnp.allclose(out, ref, atol=1e-5, rtol=1e-5)

    # Secondary check: non-aligned shapes exercise the padding + batch tiling.
    batch2, in2, hid2, out2 = 37, 100, 200, 3
    kx2, kp2 = jax.random.split(key)
    x2 = jax.random.normal(kx2, (batch2, in2), jnp.float32)
    p2 = init_params(kp2, in2, hid2, out2)
    o2 = jax.block_until_ready(mlp_forward(x2, *p2, block_batch=32))
    r2 = reference_forward(x2, *p2)
    assert o2.shape == (batch2, out2)
    assert jnp.allclose(o2, r2, atol=1e-5, rtol=1e-5)

    print("KERNEL_OK")
</pallas_src>

<mosaic_0001>
module attributes {stable_mosaic.version = 11 : i64} {
  func.func @mlp_kernel(%arg0: i32, %arg1: memref<8x128xf32, #tpu.memory_space<vmem>>, %arg2: memref<128x128xf32, #tpu.memory_space<vmem>>, %arg3: memref<1x128xf32, #tpu.memory_space<vmem>>, %arg4: memref<128x128xf32, #tpu.memory_space<vmem>>, %arg5: memref<1x128xf32, #tpu.memory_space<vmem>>, %arg6: memref<8x128xf32, #tpu.memory_space<vmem>>) attributes {dimension_semantics = [#tpu.dimension_semantics<parallel>], iteration_bounds = array<i64: 1>, scalar_prefetch = 0 : i64, scratch_operands = 0 : i64, tpu.core_type = #tpu.core_type<tc>, window_params = [{transform_indices = @transform_0, window_bounds = array<i64: 8, 128>}, {pipeline_mode = #tpu.pipeline_mode<synchronous>, transform_indices = @transform_1, window_bounds = array<i64: 128, 128>}, {pipeline_mode = #tpu.pipeline_mode<synchronous>, transform_indices = @transform_2, window_bounds = array<i64: 1, 128>}, {pipeline_mode = #tpu.pipeline_mode<synchronous>, transform_indices = @transform_3, window_bounds = array<i64: 128, 128>}, {pipeline_mode = #tpu.pipeline_mode<synchronous>, transform_indices = @transform_4, window_bounds = array<i64: 1, 128>}, {transform_indices = @transform_5, window_bounds = array<i64: 8, 128>}]} {
    %c0 = arith.constant 0 : index
    %c0_0 = arith.constant 0 : index
    %0 = vector.load %arg1[%c0, %c0_0] : memref<8x128xf32, #tpu.memory_space<vmem>>, vector<8x128xf32>
    %c0_1 = arith.constant 0 : index
    %c0_2 = arith.constant 0 : index
    %1 = vector.load %arg2[%c0_1, %c0_2] : memref<128x128xf32, #tpu.memory_space<vmem>>, vector<128x128xf32>
    %cst = arith.constant dense<0.000000e+00> : vector<8x128xf32>
    %2 = tpu.matmul %0, %1, %cst {dimension_numbers = #tpu.dot_dimension_numbers<[1], [0], [0], [1], [0, 0, 1, 1], [], []>} : vector<8x128xf32>, vector<128x128xf32>, vector<8x128xf32> -> vector<8x128xf32>
    %c0_3 = arith.constant 0 : index
    %c0_4 = arith.constant 0 : index
    %3 = vector.load %arg3[%c0_3, %c0_4] : memref<1x128xf32, #tpu.memory_space<vmem>>, vector<1x128xf32>
    %4 = vector.broadcast %3 : vector<1x128xf32> to vector<8x128xf32>
    %5 = arith.addf %2, %4 : vector<8x128xf32>
    %cst_5 = arith.constant 0.000000e+00 : f32
    %6 = vector.broadcast %cst_5 : f32 to vector<8x128xf32>
    %7 = arith.maximumf %5, %6 : vector<8x128xf32>
    %c0_6 = arith.constant 0 : index
    %c0_7 = arith.constant 0 : index
    %8 = vector.load %arg4[%c0_6, %c0_7] : memref<128x128xf32, #tpu.memory_space<vmem>>, vector<128x128xf32>
    %cst_8 = arith.constant dense<0.000000e+00> : vector<8x128xf32>
    %9 = tpu.matmul %7, %8, %cst_8 {dimension_numbers = #tpu.dot_dimension_numbers<[1], [0], [0], [1], [0, 0, 1, 1], [], []>} : vector<8x128xf32>, vector<128x128xf32>, vector<8x128xf32> -> vector<8x128xf32>
    %c0_9 = arith.constant 0 : index
    %c0_10 = arith.constant 0 : index
    %10 = vector.load %arg5[%c0_9, %c0_10] : memref<1x128xf32, #tpu.memory_space<vmem>>, vector<1x128xf32>
    %11 = vector.broadcast %10 : vector<1x128xf32> to vector<8x128xf32>
    %12 = arith.addf %9, %11 : vector<8x128xf32>
    %cst_11 = arith.constant 0.000000e+00 : f32
    %13 = vector.broadcast %cst_11 : f32 to vector<8x128xf32>
    %14 = arith.subf %13, %12 : vector<8x128xf32>
    %15 = math.exp %14 : vector<8x128xf32>
    %cst_12 = arith.constant 1.000000e+00 : f32
    %16 = vector.broadcast %cst_12 : f32 to vector<8x128xf32>
    %17 = arith.addf %16, %15 : vector<8x128xf32>
    %18 = tpu.reciprocal %17 : vector<8x128xf32> -> vector<8x128xf32>
    %c0_13 = arith.constant 0 : index
    %c0_14 = arith.constant 0 : index
    %19 = vector.load %arg6[%c0_13, %c0_14] : memref<8x128xf32, #tpu.memory_space<vmem>>, vector<8x128xf32>
    tpu.vector_store %arg6[%c0_13, %c0_14], %18 {strides = array<i32>} : memref<8x128xf32, #tpu.memory_space<vmem>>, vector<8x128xf32>,
    return
  }
  func.func @transform_0(%arg0: i32) -> (i32, i32) {
    %c0_i32 = arith.constant 0 : i32
    %c0_i32_0 = arith.constant 0 : i32
    return %arg0, %c0_i32 : i32, i32
  }
  func.func @transform_1(%arg0: i32) -> (i32, i32) {
    %c0_i32 = arith.constant 0 : i32
    %c0_i32_0 = arith.constant 0 : i32
    %c0_i32_1 = arith.constant 0 : i32
    return %c0_i32, %c0_i32_0 : i32, i32
  }
  func.func @transform_2(%arg0: i32) -> (i32, i32) {
    %c0_i32 = arith.constant 0 : i32
    %c0_i32_0 = arith.constant 0 : i32
    %c0_i32_1 = arith.constant 0 : i32
    return %c0_i32, %c0_i32_0 : i32, i32
  }
  func.func @transform_3(%arg0: i32) -> (i32, i32) {
    %c0_i32 = arith.constant 0 : i32
    %c0_i32_0 = arith.constant 0 : i32
    %c0_i32_1 = arith.constant 0 : i32
    return %c0_i32, %c0_i32_0 : i32, i32
  }
  func.func @transform_4(%arg0: i32) -> (i32, i32) {
    %c0_i32 = arith.constant 0 : i32
    %c0_i32_0 = arith.constant 0 : i32
    %c0_i32_1 = arith.constant 0 : i32
    return %c0_i32, %c0_i32_0 : i32, i32
  }
  func.func @transform_5(%arg0: i32) -> (i32, i32) {
    %c0_i32 = arith.constant 0 : i32
    %c0_i32_0 = arith.constant 0 : i32
    return %arg0, %c0_i32 : i32, i32
  }
}

</mosaic_0001>

<bundles_post_ra>
// kernel: mlp_forward.1
= control target key start
LH: loop header
LB: loop body
LE: loop exit
PB: predicated region body
PF: predicated region fallthrough
CT: control target
= control target key end

     0   :  { %v364_v1 = vmov 0.0   ;;  %vm365_vm0 = vmmov 0   ;;  %s539_s0 = inlined_call_operand.vmem [shape: f32[8,128], index: 0, kind: input, shape index: {}]   ;;  %s540_s1 = inlined_call_operand.vmem [shape: f32[128,128], index: 1, kind: input, shape index: {}]   ;;  %s541_s2 = inlined_call_operand.vmem [shape: f32[1,128], index: 2, kind: input, shape index: {}]   ;;  %s542_s3 = inlined_call_operand.vmem [shape: f32[128,128], index: 3, kind: input, shape index: {}]   ;;  %s543_s4 = inlined_call_operand.vmem [shape: f32[1,128], index: 4, kind: input, shape index: {}]   ;;  %s544_s5 = inlined_call_operand.hbm [shape: f32[8,128], index: 5, kind: output, shape index: {}]  }
   0x1   :  { %v37_v0 = vld [vmem:[%s540_s1 + $0x78] sm:$0xff]  ;;  %265 = vmatprep.subr.mxu0 %v364_v1  ;;  %v36_v2 = vld [vmem:[%s540_s1 + $0x70] sm:$0xff]  ;;  %297 = vmatprep.mubr.msk.f32.mxu0 %vm365_vm0, %v364_v1  ;;  %v35_v3 = vld [vmem:[%s540_s1 + $0x68] sm:$0xff] }
   0x2   :  { %266 = vmatpush3.msra.mxu0 %v37_v0  ;;  %300 = vmatprep.subr.mxu1 %v364_v1  ;;  %v34_v4 = vld [vmem:[%s540_s1 + $0x60] sm:$0xff]  ;;  %v131_v5 = vld [vmem:[%s542_s3 + $0x78] sm:$0xff]  ;;  %v130_v6 = vld [vmem:[%s542_s3 + $0x70] sm:$0xff] }
   0x3   :  { %267 = vmatprep.subr.mxu0 %v364_v1  ;;  %332 = vmatprep.mubr.msk.f32.mxu1 %vm365_vm0, %v364_v1  ;;  %v33_v7 = vld [vmem:[%s540_s1 + $0x58] sm:$0xff]  ;;  %v129_v8 = vld [vmem:[%s542_s3 + $0x68] sm:$0xff]  ;;  %v32_v9 = vld [vmem:[%s540_s1 + $0x50] sm:$0xff] }
   0x4   :  { %268 = vmatpush3.msra.mxu0 %v36_v2  ;;  %301 = vmatpush3.msra.mxu1 %v131_v5  ;;  %v128_v10 = vld [vmem:[%s542_s3 + $0x60] sm:$0xff] }
   0x5   :  { %269 = vmatprep.subr.mxu0 %v364_v1  ;;  %302 = vmatprep.subr.mxu1 %v364_v1 }
   0x6   :  { %270 = vmatpush3.msra.mxu0 %v35_v3  ;;  %303 = vmatpush3.msra.mxu1 %v130_v6 }
   0x7   :  { %271 = vmatprep.subr.mxu0 %v364_v1  ;;  %304 = vmatprep.subr.mxu1 %v364_v1 }
   0x8   :  { %272 = vmatpush3.msra.mxu0 %v34_v4  ;;  %305 = vmatpush3.msra.mxu1 %v129_v8 }
   0x9   :  { %273 = vmatprep.subr.mxu0 %v364_v1 }
   0xa   :  { %274 = vmatpush3.msra.mxu0 %v33_v7 }
   0xb   :  { %10 = vsyncpa [#allocation3], 0  ;;  %275 = vmatprep.subr.mxu0 %v364_v1  ;;  %v31_v11 = vld [vmem:[%s540_s1 + $0x48] sm:$0xff]  ;;  %306 = vmatprep.subr.mxu1 %v364_v1  ;;  %v127_v12 = vld [vmem:[%s542_s3 + $0x58] sm:$0xff] }
   0xc   :  { %276 = vmatpush3.msra.mxu0 %v32_v9  ;;  %307 = vmatpush3.msra.mxu1 %v128_v10  ;;  %v30_v13 = vld [vmem:[%s540_s1 + $0x40] sm:$0xff]  ;;  %v126_v14 = vld [vmem:[%s542_s3 + $0x50] sm:$0xff]  ;;  %v29_v15 = vld [vmem:[%s540_s1 + $0x38] sm:$0xff] }
   0xd   :  { %277 = vmatprep.subr.mxu0 %v364_v1  ;;  %308 = vmatprep.subr.mxu1 %v364_v1  ;;  %v125_v16 = vld [vmem:[%s542_s3 + $0x48] sm:$0xff]  ;;  %v28_v17 = vld [vmem:[%s540_s1 + $0x30] sm:$0xff]  ;;  %v124_v18 = vld [vmem:[%s542_s3 + $0x40] sm:$0xff] }
   0xe   :  { %278 = vmatpush3.msra.mxu0 %v31_v11  ;;  %309 = vmatpush3.msra.mxu1 %v127_v12  ;;  %v27_v19 = vld [vmem:[%s540_s1 + $0x28] sm:$0xff]  ;;  %v123_v20 = vld [vmem:[%s542_s3 + $0x38] sm:$0xff]  ;;  %v26_v21 = vld [vmem:[%s540_s1 + $0x20] sm:$0xff] }
   0xf   :  { %279 = vmatprep.subr.mxu0 %v364_v1  ;;  %310 = vmatprep.subr.mxu1 %v364_v1  ;;  %v122_v22 = vld [vmem:[%s542_s3 + $0x30] sm:$0xff]  ;;  %v25_v23 = vld [vmem:[%s540_s1 + $0x18] sm:$0xff]  ;;  %v121_v24 = vld [vmem:[%s542_s3 + $0x28] sm:$0xff] }
  0x10   :  { %280 = vmatpush3.msra.mxu0 %v30_v13  ;;  %311 = vmatpush3.msra.mxu1 %v126_v14  ;;  %v24_v25 = vld [vmem:[%s540_s1 + $0x10] sm:$0xff]  ;;  %v120_v26 = vld [vmem:[%s542_s3 + $0x20] sm:$0xff]  ;;  %v23_v27 = vld [vmem:[%s540_s1 + $0x8] sm:$0xff] }
  0x11   :  { %281 = vmatprep.subr.mxu0 %v364_v1  ;;  %312 = vmatprep.subr.mxu1 %v364_v1  ;;  %v119_v28 = vld [vmem:[%s542_s3 + $0x18] sm:$0xff]  ;;  %v22_v29 = vld [vmem:[%s540_s1] sm:$0xff]  ;;  %v118_v31 = vld [vmem:[%s542_s3 + $0x10] sm:$0xff] }
  0x12   :  { %282 = vmatpush3.msra.mxu0 %v29_v15  ;;  %313 = vmatpush3.msra.mxu1 %v125_v16  ;;  %v21_v30 = vld [vmem:[%s539_s0] sm:$0xff]  ;;  %v117_v32 = vld [vmem:[%s542_s3 + $0x8] sm:$0xff] }
  0x13   :  { %283 = vmatprep.subr.mxu0 %v364_v1  ;;  %314 = vmatprep.subr.mxu1 %v364_v1  ;;  %v116_v33 = vld [vmem:[%s542_s3] sm:$0xff]  ;;  %s366_s3 = smov [#allocation2]  }
  0x14   :  { %284 = vmatpush3.msra.mxu0 %v28_v17  ;;  %315 = vmatpush3.msra.mxu1 %v124_v18  ;;  %v229_v34 = vld [vmem:[%s541_s2] ss:$0 sm:$0xff]  ;;  %s221_s2 = sshll.u32 %s366_s3, 4  ;;  %s222_s2 = int_to_ptr.vmem [resolvable:$true] %s221_s2 }
  0x15   :  { %285 = vmatprep.subr.mxu0 %v364_v1  ;;  %316 = vmatprep.subr.mxu1 %v364_v1  ;;  %v230_v39 = vld [vmem:[%s543_s4] ss:$0 sm:$0xff]  ;;  %s342_s11 = scalar_lea.vmem %s222_s2, 128  ;;  %p347_p1 = scmp.lt.s32.totalorder %s222_s2, %s222_s2 }
  0x16   :  { %286 = vmatpush3.msra.mxu0 %v27_v19  ;;  %317 = vmatpush3.msra.mxu1 %v123_v20  ;;  %p343_p0 = scmp.ne.s32.totalorder %s222_s2, %s342_s11  ;;  %p348_p2 = scmp.lt.s32.totalorder %s342_s11, %s342_s11 }
  0x17   :  { %287 = vmatprep.subr.mxu0 %v364_v1  ;;  %318 = vmatprep.subr.mxu1 %v364_v1 }
  0x18   :  { %288 = vmatpush3.msra.mxu0 %v26_v21  ;;  %319 = vmatpush3.msra.mxu1 %v122_v22  ;;  %p349_p3 = por %p348_p2, %p347_p1 }
  0x19   :  { %289 = vmatprep.subr.mxu0 %v364_v1  ;;  %320 = vmatprep.subr.mxu1 %v364_v1 }
  0x1a   :  { %290 = vmatpush3.msra.mxu0 %v25_v23  ;;  %321 = vmatpush3.msra.mxu1 %v121_v24  ;;  %p350_p4 = pnand %p349_p3, %p343_p0 }
  0x1b   :  { %291 = vmatprep.subr.mxu0 %v364_v1  ;;  %322 = vmatprep.subr.mxu1 %v364_v1 }
  0x1c   :  { %292 = vmatpush3.msra.mxu0 %v24_v25  ;;  %323 = vmatpush3.msra.mxu1 %v120_v26 }
  0x1d   :  { %293 = vmatprep.subr.mxu0 %v364_v1  ;;  %324 = vmatprep.subr.mxu1 %v364_v1 }
  0x1e   :  { %294 = vmatpush3.msra.mxu0 %v23_v27  ;;  %325 = vmatpush3.msra.mxu1 %v119_v28 }
  0x1f   :  { %295 = vmatprep.subr.mxu0 %v364_v1  ;;  %326 = vmatprep.subr.mxu1 %v364_v1 }
  0x20   :  { %296 = vmatpush3.msra.mxu0 %v22_v29  ;;  %327 = vmatpush3.msra.mxu1 %v118_v31 }
  0x21   :  { %298 = vmatmul.mubr.f32.vlgmr.msra.gmra.mxu0 %v21_v30  ;;  %328 = vmatprep.subr.mxu1 %v364_v1 }
  0x22   :  { %329 = vmatpush3.msra.mxu1 %v117_v32 }
  0x23   :  { %330 = vmatprep.subr.mxu1 %v364_v1 }
  0x24   :  { %331 = vmatpush3.msra.mxu1 %v116_v33 }
  0xe1   :  { %v111_v35 = vpop.f32.mrf.mxu0 }
  0xe2   :  { %v112_v36 = vadd.f32 %v229_v34, %v111_v35 }
  0xe3   :  { %v299_v37 = vpop.f32.mrf.mxu0 }
  0xe4   :  { %v115_v38 = vmax.f32 %v112_v36, 0.0 }
  0xe6   :  { %333 = vmatmul.mubr.f32.vlgmr.msra.gmra.mxu1 %v115_v38 }
 0x1a6   :  { %v205_v40 = vpop.f32.mrf.mxu1 }
 0x1a7   :  { %v206_v41 = vadd.f32 %v230_v39, %v205_v40 }
 0x1a8   :  { %v334_v42 = vpop.f32.mrf.mxu1 }
 0x1a9   :  { %v209_v43 = vsub.f32 0.0, %v206_v41 }
 0x1ab   :  { %v210_v44 = vmul.f32 1.442695, %v209_v43 }
 0x1ad   :  { %338 = vpow2.f32 %v210_v44 }
 0x1ba   :  { %v339_v45 = vpop.eup %338 }
 0x1bb   :  { %v212_v46 = vadd.f32 1.0, %v339_v45 }
 0x1bd   :  { %340 = vrcp.f32 %v212_v46 }
 0x1ca   :  { %v341_v47 = vpop.eup %340 }
 0x1cb   :  { %214 = vst [vmem:[#allocation2] sm:$0xff] %v341_v47 }
 0x1cc   :  { %353 = shalt.err (!%p350_p4)
}
 0x1cd   :  { %224 = dma.vmem_to_hbm [thread:$0]  %s222_s2, 128, %s544_s5, [#allocation3]  }
 0x1ce   :  { %362 = dma.done.wait [#allocation3], 128  }
 0x1cf   :  { %363 = vsyncadd [#allocation3], 4294967168 }
 0x1d0   :  { %228 = vsyncpa [#allocation3], 1 }

</bundles_post_ra>
